<compile_context>
chip_gen: v7x
topology: tpu7x:2x2x1
jax: 0.10.0
libtpu: 0.0.40
codegen_flags: <defaults>
</compile_context>

<pallas_src>
from functools import partial

import numpy as np
import jax
import jax.numpy as jnp
from jax.experimental import pallas as pl
from jax.experimental.pallas import tpu as pltpu


# ----------------------------------------------------------------------------
# Chip detection (conservative: unknown -> f32 elementwise, single row block)
# ----------------------------------------------------------------------------
def _tpu_generation():
    try:
        kind = jax.devices()[0].device_kind.lower()
    except Exception:
        return 0
    for g in (7, 6, 5, 4, 3, 2):
        if ("v%d" % g) in kind or ("tpu%d" % g) in kind or ("tpu %d" % g) in kind:
            return g
    return 0


# ----------------------------------------------------------------------------
# Pallas kernel
# ----------------------------------------------------------------------------
def _pi_kernel(x_ref, y_ref, b_ref, d_ref, o_ref, *,
               inv_sigma2, offset, chunk, n_chunks, exp_dtype):
    """One (row-block, point-tile) grid step: accumulate into the resident
    f32 output block.  Inputs arrive pre-scaled by 1/(sqrt(2)*sigma)."""
    k = pl.program_id(1)

    @pl.when(k == 0)
    def _():
        o_ref[...] = jnp.zeros_like(o_ref)

    xg = x_ref[...]                                  # (RXB, 1) x grid (column)
    yg = y_ref[...]                                  # (RY, 1)  y grid (column)

    # Static sub-chunks: independent exp/VPU work per chunk lets the scheduler
    # overlap it with the MXU dot of the previous chunk.
    for c in range(n_chunks):
        sl = pl.ds(c * chunk, chunk)
        b = b_ref[:, sl]                             # (1, C) births (row)
        d = d_ref[:, sl]                             # (1, C) deaths (row)

        p = jnp.abs(d - b)                                            # (1, C)
        nz = jnp.where(p > (0.5 * offset), 1.0, 0.0)                  # (1, C)
        w = 0.5 * (1.0 - jnp.cos(jnp.clip(p, 0.0, offset) * (np.pi / offset)))
        coef = (nz * w * inv_sigma2).astype(exp_dtype)                # (1, C)

        dxb = xg - b                                                  # (RXB, C)
        dyp = yg - p                                                  # (RY, C)
        # Argument built in f32; exp in bf16 on bf16-EUP chips, f32 otherwise.
        xt = jnp.exp((-(dxb * dxb)).astype(exp_dtype))                # (RXB, C)
        yt = jnp.exp((-(dyp * dyp)).astype(exp_dtype))                # (RY, C)

        xw = (coef * xt).astype(jnp.bfloat16)        # weighted lhs, bf16 for MXU
        yb = yt.astype(jnp.bfloat16)

        # PI_blk[r, s] += sum_i xw[r, i] * yb[s, i]  (NT contraction -> MXU,
        # f32 accumulation in the resident output block)
        o_ref[...] += jax.lax.dot_general(
            xw, yb, (((1,), (1,)), ((), ())),
            preferred_element_type=jnp.float32)


# ----------------------------------------------------------------------------
# Wrapper (plain-JAX glue: scaling / padding / layout only)
# ----------------------------------------------------------------------------
def persistence_image(b, d, x_grid, y_grid, *, sigma, offset, tile_p=2048):
    b = jnp.asarray(b, jnp.float32).reshape(-1)
    d = jnp.asarray(d, jnp.float32).reshape(-1)
    x_grid = jnp.asarray(x_grid, jnp.float32).reshape(-1)
    y_grid = jnp.asarray(y_grid, jnp.float32).reshape(-1)
    res = int(x_grid.shape[0])
    n_pts = int(b.shape[0])
    sigma = float(sigma)
    offset = float(offset)

    gen = _tpu_generation()
    exp_dtype = jnp.bfloat16 if gen >= 6 else jnp.float32   # v5e: f32 EUP only
    n_row = 2 if gen >= 7 else 1                            # v7x: 2 TensorCores

    # Pre-scale everything that enters a Gaussian by 1/(sqrt(2)*sigma); the
    # window/mask thresholds scale identically, so the math is unchanged.
    scl = 1.0 / (np.sqrt(2.0) * sigma)
    offset_s = offset * scl

    # Row (x) axis padded to a sublane multiple per row block; column (y) axis
    # skips the 128-lane pad for res < 128 (full-dim output block is legal and
    # the single masked store at writeback is negligible).
    rx = pl.cdiv(res, 8 * n_row) * 8 * n_row
    ry = pl.cdiv(res, 8) * 8 if res < 128 else pl.cdiv(res, 128) * 128
    rx_blk = rx // n_row

    # Points padding: b = d = 0 -> p = 0 -> nz = 0 -> zero contribution.
    tile_p = max(128, (int(tile_p) // 128) * 128)
    tp = int(min(tile_p, max(128, pl.cdiv(max(n_pts, 1), 128) * 128)))
    n_tiles = max(1, pl.cdiv(n_pts, tp))
    p_pad = n_tiles * tp

    n_chunks = 1
    for cand in (4, 2):
        if tp % cand == 0 and tp // cand >= 256:
            n_chunks = cand
            break
    chunk = tp // n_chunks

    x_col = jnp.zeros((rx, 1), jnp.float32).at[:res, 0].set(x_grid * scl)
    y_col = jnp.zeros((ry, 1), jnp.float32).at[:res, 0].set(y_grid * scl)
    b_row = jnp.zeros((1, p_pad), jnp.float32).at[0, :n_pts].set(b * scl)
    d_row = jnp.zeros((1, p_pad), jnp.float32).at[0, :n_pts].set(d * scl)

    flops = 2 * rx * ry * p_pad + 8 * (rx + n_row * ry) * p_pad
    transcendentals = (rx + n_row * ry + n_row) * p_pad
    bytes_accessed = 4 * (rx + ry + 2 * p_pad + rx * ry)

    out = pl.pallas_call(
        partial(_pi_kernel,
                inv_sigma2=1.0 / (sigma * sigma),
                offset=offset_s,
                chunk=chunk,
                n_chunks=n_chunks,
                exp_dtype=exp_dtype),
        out_shape=jax.ShapeDtypeStruct((rx, ry), jnp.float32),
        grid_spec=pltpu.PrefetchScalarGridSpec(
            num_scalar_prefetch=0,
            grid=(n_row, n_tiles),                        # (rows, point tiles)
            in_specs=[
                pl.BlockSpec((rx_blk, 1), lambda i, k: (i, 0)),  # x grid rows
                pl.BlockSpec((ry, 1), lambda i, k: (0, 0)),      # y grid
                pl.BlockSpec((1, tp), lambda i, k: (0, k)),      # births tile
                pl.BlockSpec((1, tp), lambda i, k: (0, k)),      # deaths tile
            ],
            out_specs=pl.BlockSpec((rx_blk, ry), lambda i, k: (i, 0)),
        ),
        compiler_params=pltpu.CompilerParams(
            dimension_semantics=("parallel", "arbitrary")),
        cost_estimate=pl.CostEstimate(
            flops=flops,
            transcendentals=transcendentals,
            bytes_accessed=bytes_accessed),
    )(x_col, y_col, b_row, d_row)

    return out[:res, :res]


# ----------------------------------------------------------------------------
# Module equivalent
# ----------------------------------------------------------------------------
class PersistenceImagePallas:
    def __init__(self, res, sigma, square=(0.0, 1.0)):
        self.sigma = float(sigma)
        self.resolution = int(res)
        self.range = abs(square[1] - square[0])
        self.offset = self.range / (self.resolution - 3)
        self.x = jnp.linspace(square[0] - self.offset, square[1] + self.offset,
                              self.resolution, dtype=jnp.float32)
        self.y = jnp.linspace(-self.offset, self.range + self.offset,
                              self.resolution, dtype=jnp.float32)
        self.r = 2

    def __call__(self, b, d):
        # TODO(synk): the PyTorch `if N > 0` Python branch is replaced by an
        # unconditional masked compute (identical result, zeros when N == 0).
        return persistence_image(b, d, self.x, self.y,
                                 sigma=self.sigma, offset=self.offset)


# ----------------------------------------------------------------------------
# Plain-JAX reference of the PyTorch math (for validation only)
# ----------------------------------------------------------------------------
def _reference(b, d, m):
    p = jnp.abs(d - b)
    nz = (p > m.offset / 2).astype(jnp.float32)
    X = jnp.exp(-((b[:, None] - m.x[None, :]) ** 2) / (2.0 * m.sigma ** 2)).T
    Y = jnp.exp(-((p[:, None] - m.y[None, :]) ** 2) / (2.0 * m.sigma ** 2))
    w = (1.0 - jnp.cos(jnp.clip(p, 0.0, m.offset) * np.pi / m.offset)) / 2.0
    Y = (nz * w)[:, None] * Y
    return (X @ Y) / m.sigma ** 2


if __name__ == "__main__":
    key = jax.random.PRNGKey(0)
    kb, kd = jax.random.split(key)

    res = 64
    sigma = 0.05
    n_pts = 96

    model = PersistenceImagePallas(res, sigma, square=[0.0, 1.0])

    b = jax.random.uniform(kb, (n_pts,), jnp.float32, 0.0, 0.7)
    d = b + jax.random.uniform(kd, (n_pts,), jnp.float32, 0.0, 0.3)

    pi = model(b, d)
    pi = jax.block_until_ready(pi)

    assert pi.shape == (res, res), pi.shape
    assert bool(jnp.all(jnp.isfinite(pi)))

    # Tolerance accounts for bf16 MXU operands (and bf16 exp on v6e/v7x) with
    # f32 accumulation: ~0.3-1% relative to the image peak in practice.
    ref = _reference(b, d, model)
    err = float(jnp.max(jnp.abs(pi - ref)))
    tol = 2e-2 * float(jnp.max(jnp.abs(ref))) + 1e-3
    assert err <= tol, (err, tol)

    print("KERNEL_OK")
</pallas_src>

<mosaic_0001>
module attributes {stable_mosaic.version = 11 : i64} {
  func.func @_pi_kernel(%arg0: i32, %arg1: i32, %arg2: memref<64x1xf32, #tpu.memory_space<vmem>>, %arg3: memref<64x1xf32, #tpu.memory_space<vmem>>, %arg4: memref<1x128xf32, #tpu.memory_space<vmem>>, %arg5: memref<1x128xf32, #tpu.memory_space<vmem>>, %arg6: memref<64x64xf32, #tpu.memory_space<vmem>>) attributes {dimension_semantics = [#tpu.dimension_semantics<parallel>, #tpu.dimension_semantics<arbitrary>], iteration_bounds = array<i64: 1, 1>, scalar_prefetch = 0 : i64, scratch_operands = 0 : i64, tpu.core_type = #tpu.core_type<tc>, window_params = [{transform_indices = @transform_0, window_bounds = array<i64: 64, 1>}, {pipeline_mode = #tpu.pipeline_mode<synchronous>, transform_indices = @transform_1, window_bounds = array<i64: 64, 1>}, {transform_indices = @transform_2, window_bounds = array<i64: 1, 128>}, {transform_indices = @transform_3, window_bounds = array<i64: 1, 128>}, {transform_indices = @transform_4, window_bounds = array<i64: 64, 64>}]} {
    %c0_i32 = arith.constant 0 : i32
    %0 = arith.cmpi eq, %arg1, %c0_i32 : i32
    %1 = arith.extui %0 : i1 to i32
    %c0_i32_0 = arith.constant 0 : i32
    %2 = arith.cmpi ne, %1, %c0_i32_0 : i32
    scf.if %2 {
      %cst_23 = arith.constant 0.000000e+00 : f32
      %50 = vector.broadcast %cst_23 : f32 to vector<64x64xf32>
      %c0_24 = arith.constant 0 : index
      %c0_25 = arith.constant 0 : index
      %51 = vector.load %arg6[%c0_24, %c0_25] : memref<64x64xf32, #tpu.memory_space<vmem>>, vector<64x64xf32>
      tpu.vector_store %arg6[%c0_24, %c0_25], %50 {strides = array<i32>} : memref<64x64xf32, #tpu.memory_space<vmem>>, vector<64x64xf32>,
    } else {
    }
    %c0 = arith.constant 0 : index
    %c0_1 = arith.constant 0 : index
    %3 = vector.load %arg2[%c0, %c0_1] : memref<64x1xf32, #tpu.memory_space<vmem>>, vector<64x1xf32>
    %c0_2 = arith.constant 0 : index
    %c0_3 = arith.constant 0 : index
    %4 = vector.load %arg3[%c0_2, %c0_3] : memref<64x1xf32, #tpu.memory_space<vmem>>, vector<64x1xf32>
    %c0_4 = arith.constant 0 : index
    %c0_5 = arith.constant 0 : index
    %5 = vector.load %arg4[%c0_4, %c0_5] : memref<1x128xf32, #tpu.memory_space<vmem>>, vector<1x128xf32>
    %c0_6 = arith.constant 0 : index
    %c0_7 = arith.constant 0 : index
    %6 = vector.load %arg5[%c0_6, %c0_7] : memref<1x128xf32, #tpu.memory_space<vmem>>, vector<1x128xf32>
    %7 = arith.subf %6, %5 : vector<1x128xf32>
    %8 = math.absf %7 : vector<1x128xf32>
    %cst = arith.constant 0.115919143 : f32
    %9 = vector.broadcast %cst : f32 to vector<1x128xf32>
    %10 = arith.cmpf ogt, %8, %9 : vector<1x128xf32>
    %cst_8 = arith.constant 1.000000e+00 : f32
    %cst_9 = arith.constant 0.000000e+00 : f32
    %11 = vector.broadcast %cst_8 : f32 to vector<1x128xf32>
    %12 = vector.broadcast %cst_9 : f32 to vector<1x128xf32>
    %13 = arith.select %10, %11, %12 : vector<1x128xi1>, vector<1x128xf32>
    %cst_10 = arith.constant 0.000000e+00 : f32
    %cst_11 = arith.constant 0.231838286 : f32
    %14 = vector.broadcast %cst_10 : f32 to vector<1x128xf32>
    %15 = arith.maximumf %14, %8 : vector<1x128xf32>
    %16 = vector.broadcast %cst_11 : f32 to vector<1x128xf32>
    %17 = arith.minimumf %16, %15 : vector<1x128xf32>
    %cst_12 = arith.constant 13.5507927 : f32
    %18 = vector.broadcast %cst_12 : f32 to vector<1x128xf32>
    %19 = arith.mulf %17, %18 : vector<1x128xf32>
    %20 = math.cos %19 : vector<1x128xf32>
    %cst_13 = arith.constant 1.000000e+00 : f32
    %21 = vector.broadcast %cst_13 : f32 to vector<1x128xf32>
    %22 = arith.subf %21, %20 : vector<1x128xf32>
    %cst_14 = arith.constant 5.000000e-01 : f32
    %23 = vector.broadcast %cst_14 : f32 to vector<1x128xf32>
    %24 = arith.mulf %23, %22 : vector<1x128xf32>
    %25 = arith.mulf %13, %24 : vector<1x128xf32>
    %cst_15 = arith.constant 4.000000e+02 : f32
    %26 = vector.broadcast %cst_15 : f32 to vector<1x128xf32>
    %27 = arith.mulf %25, %26 : vector<1x128xf32>
    %28 = vector.broadcast %3 : vector<64x1xf32> to vector<64x128xf32>
    %29 = vector.broadcast %5 : vector<1x128xf32> to vector<64x128xf32>
    %30 = arith.subf %28, %29 : vector<64x128xf32>
    %31 = vector.broadcast %4 : vector<64x1xf32> to vector<64x128xf32>
    %32 = vector.broadcast %8 : vector<1x128xf32> to vector<64x128xf32>
    %33 = arith.subf %31, %32 : vector<64x128xf32>
    %34 = arith.mulf %30, %30 : vector<64x128xf32>
    %cst_16 = arith.constant 0.000000e+00 : f32
    %35 = vector.broadcast %cst_16 : f32 to vector<64x128xf32>
    %36 = arith.subf %35, %34 : vector<64x128xf32>
    %37 = math.exp %36 : vector<64x128xf32>
    %38 = arith.mulf %33, %33 : vector<64x128xf32>
    %cst_17 = arith.constant 0.000000e+00 : f32
    %39 = vector.broadcast %cst_17 : f32 to vector<64x128xf32>
    %40 = arith.subf %39, %38 : vector<64x128xf32>
    %41 = math.exp %40 : vector<64x128xf32>
    %42 = vector.broadcast %27 : vector<1x128xf32> to vector<64x128xf32>
    %43 = arith.mulf %42, %37 : vector<64x128xf32>
    %44 = arith.truncf %43 : vector<64x128xf32> to vector<64x128xbf16>
    %45 = arith.truncf %41 : vector<64x128xf32> to vector<64x128xbf16>
    %c0_18 = arith.constant 0 : index
    %c0_19 = arith.constant 0 : index
    %46 = vector.load %arg6[%c0_18, %c0_19] : memref<64x64xf32, #tpu.memory_space<vmem>>, vector<64x64xf32>
    %cst_20 = arith.constant dense<0.000000e+00> : vector<64x64xf32>
    %47 = tpu.matmul %44, %45, %cst_20 {dimension_numbers = #tpu.dot_dimension_numbers<[1], [1], [0], [0], [0, 0, 1, 0], [], []>} : vector<64x128xbf16>, vector<64x128xbf16>, vector<64x64xf32> -> vector<64x64xf32>
    %48 = arith.addf %46, %47 : vector<64x64xf32>
    %c0_21 = arith.constant 0 : index
    %c0_22 = arith.constant 0 : index
    %49 = vector.load %arg6[%c0_21, %c0_22] : memref<64x64xf32, #tpu.memory_space<vmem>>, vector<64x64xf32>
    tpu.vector_store %arg6[%c0_21, %c0_22], %48 {strides = array<i32>} : memref<64x64xf32, #tpu.memory_space<vmem>>, vector<64x64xf32>,
    return
  }
  func.func @transform_0(%arg0: i32, %arg1: i32) -> (i32, i32) {
    %c0_i32 = arith.constant 0 : i32
    %c0_i32_0 = arith.constant 0 : i32
    return %arg0, %c0_i32 : i32, i32
  }
  func.func @transform_1(%arg0: i32, %arg1: i32) -> (i32, i32) {
    %c0_i32 = arith.constant 0 : i32
    %c0_i32_0 = arith.constant 0 : i32
    %c0_i32_1 = arith.constant 0 : i32
    return %c0_i32, %c0_i32_0 : i32, i32
  }
  func.func @transform_2(%arg0: i32, %arg1: i32) -> (i32, i32) {
    %c0_i32 = arith.constant 0 : i32
    %c0_i32_0 = arith.constant 0 : i32
    return %c0_i32, %arg1 : i32, i32
  }
  func.func @transform_3(%arg0: i32, %arg1: i32) -> (i32, i32) {
    %c0_i32 = arith.constant 0 : i32
    %c0_i32_0 = arith.constant 0 : i32
    return %c0_i32, %arg1 : i32, i32
  }
  func.func @transform_4(%arg0: i32, %arg1: i32) -> (i32, i32) {
    %c0_i32 = arith.constant 0 : i32
    %c0_i32_0 = arith.constant 0 : i32
    return %arg0, %c0_i32 : i32, i32
  }
}

</mosaic_0001>

<bundles_post_ra>
// kernel: tpu_custom_call.1
= control target key start
LH: loop header
LB: loop body
LE: loop exit
PB: predicated region body
PF: predicated region fallthrough
CT: control target
= control target key end

     0   :  { %v577_v2 = vmov 0   ;;  %s739_s0 = inlined_call_operand.vmem [shape: f32[64,1], index: 0, kind: input, shape index: {}]   ;;  %s740_s1 = inlined_call_operand.vmem [shape: f32[64,1], index: 1, kind: input, shape index: {}]   ;;  %s741_s2 = inlined_call_operand.vmem [shape: f32[1,128], index: 2, kind: input, shape index: {}]   ;;  %s742_s3 = inlined_call_operand.vmem [shape: f32[1,128], index: 3, kind: input, shape index: {}]   ;;  %s743_s4 = inlined_call_operand.hbm [shape: f32[64,64], index: 4, kind: output, shape index: {}]  }
   0x1   :  { %v42_v0 = vld [vmem:[%s740_s1 + $0x10] sm:$0xff]  ;;  %v40_v1 = vld [vmem:[%s740_s1] sm:$0xff]  ;;  %516 = vset.pattern.permute.xlu1 %v577_v2  ;;  %515 = vset.pattern.permute.xlu0 %v577_v2  ;;  %v43_v3 = vld [vmem:[%s740_s1 + $0x18] sm:$0xff] }
   0x2   :  { %230 = vperm.xlu1 %516, %v42_v0   ;;  %220 = vperm.xlu0 %515, %v40_v1   ;;  %v41_v4 = vld [vmem:[%s740_s1 + $0x8] sm:$0xff]  ;;  %v628_v5 = vld [vmem:[%s741_s2] sm:$0x1] }
   0x3   :  { %v49_v6 = vld [vmem:[%s742_s3] sm:$0x1] }
   0x4   :  { %v50_v7 = vsub.f32 %v49_v6, %v628_v5 }
   0x6   :  { %235 = vperm.xlu1 %516, %v43_v3   ;;  %225 = vperm.xlu0 %515, %v41_v4  }
   0x7   :  { %9 = vsyncpa [#allocation3], 0  ;;  %v45_v8 = vld [vmem:[%s740_s1 + $0x28] sm:$0xff]  ;;  %v44_v9 = vld [vmem:[%s740_s1 + $0x20] sm:$0xff]  ;;  %v640_v10 = vand.u32 2147483647, %v50_v7 }
   0x8   :  { %v47_v12 = vld [vmem:[%s740_s1 + $0x38] sm:$0xff]  ;;  %v46_v13 = vld [vmem:[%s740_s1 + $0x30] sm:$0xff]  ;;  %v33_v16 = vld [vmem:[%s739_s0 + $0x8] sm:$0xff]  ;;  %v578_v34 = vmov 683565275   ;;  %v583_v50 = vmov 0.0  }
   0x9   :  { %v54_v11 = vmax.f32 %v640_v10, 0.0  ;;  %v32_v17 = vld [vmem:[%s739_s0] sm:$0xff]  ;;  %v37_v20 = vld [vmem:[%s739_s0 + $0x28] sm:$0xff]  ;;  %v35_v25 = vld [vmem:[%s739_s0 + $0x18] sm:$0xff]  ;;  %v579_v36 = vmov 2475754826  }
   0xa   :  { %245 = vperm.xlu1 %516, %v45_v8   ;;  %240 = vperm.xlu0 %515, %v44_v9   ;;  %v36_v21 = vld [vmem:[%s739_s0 + $0x20] sm:$0xff]  ;;  %v34_v26 = vld [vmem:[%s739_s0 + $0x10] sm:$0xff]  ;;  %v39_v31 = vld [vmem:[%s739_s0 + $0x38] sm:$0xff]  ;;  %v580_v39 = vmov 2131351028   ;;  %vm23_vm7 = vcmask 523264  }
   0xb   :  { %v55_v14 = vmin.f32 %v54_v11, 0.23183829  ;;  %v38_v32 = vld [vmem:[%s739_s0 + $0x30] sm:$0xff]  ;;  %v581_v41 = vmov 2102212464   ;;  %26 = vst.msk [vmem:[#allocation2 + $0x10] sm:$0xff] %vm23_vm7, %v583_v50 }
   0xc   :  { %v582_v43 = vmov 920167782   ;;  %vm52_vm2 = vcmp.gt.f32.partialorder %v640_v10, 0.11591914  ;;  %v584_v54 = vmov 1326507024  }
   0xd   :  { %v649_v15 = vmul.f32 13.550793, %v55_v14  ;;  %v680_v51 = vsel %vm52_vm2, 1.0, %v583_v50  ;;  %24 = vst.msk [vmem:[#allocation2] sm:$0xff] %vm23_vm7, %v583_v50  ;;  %25 = vst.msk [vmem:[#allocation2 + $0x8] sm:$0xff] %vm23_vm7, %v583_v50  ;;  %s585_s0 = smov [#allocation2]  }
   0xe   :  { %255 = vperm.xlu1 %516, %v47_v12   ;;  %250 = vperm.xlu0 %515, %v46_v13   ;;  %27 = vst.msk [vmem:[#allocation2 + $0x18] sm:$0xff] %vm23_vm7, %v583_v50  ;;  %28 = vst.msk [vmem:[#allocation2 + $0x20] sm:$0xff] %vm23_vm7, %v583_v50  ;;  %s453_s22 = sshll.u32 %s585_s0, 4  ;;  %s454_s22 = int_to_ptr.vmem [resolvable:$true] %s453_s22 }
   0xf   :  { %v60_v18 = vand.u32 2139095040, %v649_v15  ;;  %v57_v23 = vand.u32 2147483647, %v649_v15  ;;  %29 = vst.msk [vmem:[#allocation2 + $0x28] sm:$0xff] %vm23_vm7, %v583_v50  ;;  %30 = vst.msk [vmem:[#allocation2 + $0x30] sm:$0xff] %vm23_vm7, %v583_v50  ;;  %vm59_vm9 = vcmp.lt.s32.totalorder %v649_v15, 0  ;;  %vm149_vm14 = vweird.f32 %v649_v15  ;;  %p558_p1 = scmp.lt.s32.totalorder %s454_s22, %s454_s22 }
  0x10   :  { %31 = vst.msk [vmem:[#allocation2 + $0x38] sm:$0xff] %vm23_vm7, %v583_v50  ;;  %s553_s23 = scalar_lea.vmem %s454_s22, 1024 }
  0x11   :  { %v61_v19 = vshrl.u32 %v60_v18, 23  ;;  %v64_v28 = vand.u32 8388607, %v57_v23  ;;  %vm58_vm10 = vcmp.le.f32.partialorder %v57_v23, 0.7853982  ;;  %p554_p0 = scmp.ne.s32.totalorder %s454_s22, %s553_s23  ;;  %p559_p2 = scmp.lt.s32.totalorder %s553_s23, %s553_s23 }
  0x12   :  { %171 = vperm.xlu1 %516, %v33_v16   ;;  %166 = vperm.xlu0 %515, %v32_v17  }
  0x13   :  { %v464_v22 = vadd.s32 4294967169, %v61_v19  ;;  %v65_v38 = vor.u32 8388608, %v64_v28  ;;  %p560_p3 = por %p559_p2, %p558_p1 }
  0x15   :  { %v67_v24 = vadd.s32 1, %v464_v22  ;;  %v105_v60 = vshll.u32 %v65_v38, 8  ;;  %p561_p4 = pnand %p560_p3, %p554_p0 }
  0x16   :  { %191 = vperm.xlu1 %516, %v37_v20   ;;  %186 = vperm.xlu0 %515, %v36_v21  }
  0x17   :  { %vm68_vm0 = vcmp.gt.s32.totalorder %v67_v24, 0 }
  0x18   :  { %v69_v27 = vsel %vm68_vm0, %v67_v24, 0 }
  0x19   :  { %v70_v29 = vshrl.u32 %v69_v27, 5  ;;  %v71_v30 = vand.u32 31, %v69_v27 }
  0x1a   :  { %181 = vperm.xlu1 %516, %v35_v25   ;;  %176 = vperm.xlu0 %515, %v34_v26  }
  0x1b   :  { %v72_v33 = vsub.s32 32, %v71_v30  ;;  %v74_v35 = vshll.u32 %v578_v34, %v71_v30  ;;  %v77_v37 = vshll.u32 %v579_v36, %v71_v30  ;;  %v80_v40 = vshll.u32 %v580_v39, %v71_v30 }
  0x1c   :  { %v83_v42 = vshll.u32 %v581_v41, %v71_v30  ;;  %v86_v44 = vshll.u32 %v582_v43, %v71_v30  ;;  %vm89_vm1 = vcmp.lt.s32.totalorder %v70_v29, 1  ;;  %vm91_vm3 = vcmp.lt.s32.totalorder %v70_v29, 3 }
  0x1d   :  { %v73_v45 = vshrl.u32 %v578_v34, %v72_v33  ;;  %v75_v46 = vshrl.u32 %v579_v36, %v72_v33  ;;  %v78_v47 = vshrl.u32 %v580_v39, %v72_v33  ;;  %v81_v48 = vshrl.u32 %v581_v41, %v72_v33 }
  0x1e   :  { %201 = vperm.xlu1 %516, %v39_v31   ;;  %196 = vperm.xlu0 %515, %v38_v32   ;;  %v84_v49 = vshrl.u32 %v582_v43, %v72_v33  ;;  %v87_v55 = vshrl.u32 %v584_v54, %v72_v33  ;;  %vm92_vm4 = vcmp.lt.s32.totalorder %v70_v29, 4  ;;  %vm90_vm5 = vcmp.lt.s32.totalorder %v70_v29, 2 }
  0x1f   :  { %v76_v52 = vor.u32 %v75_v46, %v74_v35  ;;  %v79_v53 = vor.u32 %v78_v47, %v77_v37  ;;  %v82_v56 = vor.u32 %v81_v48, %v80_v40 }
  0x20   :  { %v85_v57 = vor.u32 %v84_v49, %v83_v42  ;;  %v88_v58 = vor.u32 %v87_v55, %v86_v44 }
  0x21   :  { %v97_v59 = vsel %vm89_vm1, %v76_v52, %v79_v53  ;;  %v93_v61 = vsel %vm89_vm1, %v73_v45, %v76_v52  ;;  %v94_v62 = vsel %vm92_vm4, %v82_v56, 2102212464  ;;  %v101_v0 = vsel %vm89_vm1, %v79_v53, %v82_v56 }
  0x22   :  { %v98_v63 = vsel %vm92_vm4, %v85_v57, 920167782  ;;  %v95_v1 = vsel %vm91_vm3, %v79_v53, %v94_v62  ;;  %v102_v3 = vsel %vm92_vm4, %v88_v58, 1326507024 }
  0x23   :  { %v99_v2 = vsel %vm91_vm3, %v82_v56, %v98_v63  ;;  %v103_v6 = vsel %vm91_vm3, %v85_v57, %v102_v3  ;;  %v96_v7 = vsel %vm90_vm5, %v93_v61, %v95_v1 }
  0x24   :  { %v100_v4 = vsel %vm90_vm5, %v97_v59, %v99_v2  ;;  %v104_v8 = vsel %vm90_vm5, %v101_v0, %v103_v6  ;;  %v112_v14 = vmul.u32 %v105_v60, %v96_v7  ;;  %v205_v59 = vlaneseq }
  0x25   :  { %v685_v9 = vmul.u32.u64.low %v105_v60, %v100_v4  ;;  %v686_v11 = vmul.u32.u64.high %v105_v60, %v100_v4, %v685_v9  ;;  %v688_v12 = vmul.u32.u64.low %v105_v60, %v104_v8  ;;  %v689_v13 = vmul.u32.u64.high %v105_v60, %v104_v8, %v688_v12 }
  0x26   :  { %v206_v60 = vshrl.u32 %v205_v59, 7 }
  0x27   :  { %v115_v16 = vadd.s32 1, %v686_v11  ;;  %vm114_vm6 = vc.u32 %v689_v13, %v685_v9  ;;  %v113_v28 = vadd.s32 %v685_v9, %v689_v13 }
  0x28   :  { %v711_v61 = vsub.s32 0, %v206_v60 }
  0x29   :  { %v116_v17 = vsel %vm114_vm6, %v115_v16, %v686_v11 }
  0x2a   :  { %v117_v18 = vadd.s32 %v116_v17, %v112_v14  ;;  %v262_v62 = vrot.slane %v640_v10, %v711_v61 }
  0x2c   :  { %v118_v19 = vadd.s32 536870912, %v117_v18 }
  0x2e   :  { %v119_v20 = vshrl.u32 %v118_v19, 30 }
  0x30   :  { %v120_v21 = vshll.u32 %v119_v20, 30  ;;  %v143_v42 = vsub.s32 4, %v119_v20 }
  0x32   :  { %v121_v22 = vsub.s32 %v117_v18, %v120_v21  ;;  %v144_v45 = vsel %vm59_vm9, %v143_v42, %v119_v20 }
  0x33   :  { %v146_v46 = vsel %vm58_vm10, 0, %v144_v45 }
  0x34   :  { %v123_v24 = vsub.s32 0, %v121_v22  ;;  %v150_v47 = vand.u32 3, %v146_v46 }
  0x36   :  { %v465_v25 = vmin.u32 %v123_v24, %v121_v22  ;;  %vm155_vm11 = vcmp.eq.s32.totalorder %v150_v47, 2  ;;  %vm152_vm12 = vcmp.eq.s32.totalorder %v150_v47, 0  ;;  %vm151_vm13 = vcmp.lt.s32.totalorder %v150_v47, 2 }
  0x38   :  { %v125_v26 = vclz %v465_v25 }
  0x3a   :  { %v466_v27 = vadd.s32 4294967294, %v125_v26 }
  0x3c   :  { %vm467_vm8 = vcmp.lt.s32.totalorder %v466_v27, 0 }
  0x3d   :  { %v128_v29 = vsel %vm467_vm8, 0, %v466_v27 }
  0x3e   :  { %v129_v30 = vsub.s32 32, %v128_v29  ;;  %v130_v31 = vshll.u32 %v121_v22, %v128_v29  ;;  %v133_v32 = vsub.s32 4294967266, %v128_v29  ;;  %v208_v29 = vrot.slane %v628_v5, %v711_v61 }
  0x40   :  { %v131_v33 = vshrl.u32 %v113_v28, %v129_v30  ;;  %v134_v34 = vadd.s32 127, %v133_v32 }
  0x42   :  { %v132_v35 = vor.u32 %v131_v33, %v130_v31  ;;  %v135_v36 = vshll.u32 %v134_v34, 23 }
  0x44   :  { %v136_v37 = vor.u32 4788187, %v135_v36  ;;  %v139_v38 = vcvt.s32.f32 %v132_v35 }
  0x46   :  { %v137_v39 = vand.u32 2147483647, %v136_v37 }
  0x48   :  { %v140_v40 = vmul.f32 %v139_v38, %v137_v39 }
  0x4a   :  { %v141_v41 = vxor.u32 2147483648, %v140_v40 }
  0x4c   :  { %v142_v43 = vsel %vm59_vm9, %v141_v41, %v140_v40 }
  0x4d   :  { %v145_v44 = vsel %vm58_vm10, %v649_v15, %v142_v43 }
  0x4e   :  { %517 = vcosq.f32 %v145_v44 }
  0x4f   :  { %519 = vsinq.f32 %v145_v44 }
  0x58   :  { %v518_v48 = vpop.eup %517 }
  0x59   :  { %v520_v49 = vpop.eup %519  ;;  %v156_v50 = vxor.u32 2147483648, %v518_v48 }
  0x5a   :  { %v153_v52 = vxor.u32 2147483648, %v520_v49 }
  0x5b   :  { %v157_v23 = vsel %vm155_vm11, %v156_v50, %v520_v49 }
  0x5c   :  { %v154_v53 = vsel %vm152_vm12, %v518_v48, %v153_v52 }
  0x5d   :  { %v158_v54 = vsel %vm151_vm13, %v154_v53, %v157_v23 }
  0x5e   :  { %v159_v55 = vsel %vm149_vm14, nan, %v158_v54 }
  0x5f   :  { %v160_v56 = vsub.f32 1.0, %v159_v55 }
  0x61   :  { %v161_v57 = vmul.f32 0.5, %v160_v56 }
  0x63   :  { %v709_v58 = vmul.f32 %v161_v57, %v680_v51 }
  0x81   :  { %v231_v63 = vpop.permute.xlu1 %230  ;;  %v221_v0 = vpop.permute.xlu0 %220 }
  0x82   :  { %v266_v1 = vsub.f32 %v231_v63, %v262_v62  ;;  %v264_v15 = vsub.f32 %v221_v0, %v262_v62 }
  0x84   :  { %v306_v2 = vmul.f32 %v266_v1, %v266_v1  ;;  %v304_v3 = vmul.f32 %v264_v15, %v264_v15 }
  0x85   :  { %v236_v4 = vpop.permute.xlu1 %235  ;;  %v226_v6 = vpop.permute.xlu0 %225 }
  0x86   :  { %v314_v7 = vsub.f32 0.0, %v306_v2  ;;  %v267_v8 = vsub.f32 %v236_v4, %v262_v62  ;;  %v265_v9 = vsub.f32 %v226_v6, %v262_v62  ;;  %v312_v51 = vsub.f32 0.0, %v304_v3 }
  0x88   :  { %v307_v11 = vmul.f32 %v267_v8, %v267_v8  ;;  %v305_v12 = vmul.f32 %v265_v9, %v265_v9  ;;  %v324_v13 = vmul.f32 1.442695, %v314_v7  ;;  %v320_v20 = vmul.f32 1.442695, %v312_v51 }
  0x89   :  { %v246_v14 = vpop.permute.xlu1 %245  ;;  %v241_v16 = vpop.permute.xlu0 %240 }
  0x8a   :  { %v315_v17 = vsub.f32 0.0, %v307_v11  ;;  %v313_v18 = vsub.f32 0.0, %v305_v12  ;;  %v269_v10 = vsub.f32 %v246_v14, %v262_v62  ;;  %v268_v19 = vsub.f32 %v241_v16, %v262_v62 }
  0x8b   :  { %521 = vpow2.f32 %v324_v13  ;;  %v163_v12 = vmul.f32 400.0, %v709_v58 }
  0x8c   :  { %v326_v21 = vmul.f32 1.442695, %v315_v17  ;;  %v322_v22 = vmul.f32 1.442695, %v313_v18  ;;  %v309_v24 = vmul.f32 %v269_v10, %v269_v10  ;;  %v308_v25 = vmul.f32 %v268_v19, %v268_v19 }
  0x8d   :  { %v256_v26 = vpop.permute.xlu1 %255  ;;  %v251_v27 = vpop.permute.xlu0 %250 }
  0x8e   :  { %523 = vpow2.f32 %v326_v21  ;;  %v271_v28 = vsub.f32 %v256_v26, %v262_v62  ;;  %v317_v30 = vsub.f32 0.0, %v309_v24  ;;  %v270_v31 = vsub.f32 %v251_v27, %v262_v62 }
  0x8f   :  { %525 = vpow2.f32 %v322_v22  ;;  %v316_v32 = vsub.f32 0.0, %v308_v25  ;;  %v340_v22 = vrot.slane %v163_v12, %v711_v61 }
  0x90   :  { %527 = vpow2.f32 %v320_v20  ;;  %v311_v33 = vmul.f32 %v271_v28, %v271_v28  ;;  %v330_v37 = vmul.f32 1.442695, %v317_v30  ;;  %v310_v38 = vmul.f32 %v270_v31, %v270_v31 }
  0x91   :  { %v172_v34 = vpop.permute.xlu1 %171  ;;  %v167_v35 = vpop.permute.xlu0 %166  ;;  %v328_v40 = vmul.f32 1.442695, %v316_v32 }
  0x92   :  { %v211_v36 = vsub.f32 %v172_v34, %v208_v29  ;;  %v210_v39 = vsub.f32 %v167_v35, %v208_v29  ;;  %v319_v42 = vsub.f32 0.0, %v311_v33  ;;  %529 = vpow2.f32 %v330_v37 }
  0x93   :  { %v318_v49 = vsub.f32 0.0, %v310_v38  ;;  %531 = vpow2.f32 %v328_v40 }
  0x94   :  { %v273_v41 = vmul.f32 %v211_v36, %v211_v36  ;;  %v272_v43 = vmul.f32 %v210_v39, %v210_v39  ;;  %v334_v56 = vmul.f32 1.442695, %v319_v42 }
  0x95   :  { %v192_v44 = vpop.permute.xlu1 %191  ;;  %v187_v45 = vpop.permute.xlu0 %186  ;;  %v332_v4 = vmul.f32 1.442695, %v318_v49 }
  0x96   :  { %v281_v46 = vsub.f32 0.0, %v273_v41  ;;  %v215_v5 = vsub.f32 %v192_v44, %v208_v29  ;;  %v214_v47 = vsub.f32 %v187_v45, %v208_v29  ;;  %v522_v48 = vpop.eup %521  ;;  %v280_v50 = vsub.f32 0.0, %v272_v43 }
  0x98   :  { %v524_v52 = vpop.eup %523  ;;  %v290_v23 = vmul.f32 1.442695, %v281_v46  ;;  %v277_v53 = vmul.f32 %v215_v5, %v215_v5  ;;  %v276_v54 = vmul.f32 %v214_v47, %v214_v47  ;;  %v288_v57 = vmul.f32 1.442695, %v280_v50  ;;  %v360_v50 = vld [vmem:[#allocation2 + $0x10] sm:$0xff] }
  0x99   :  { %v526_v55 = vpop.eup %525  ;;  %v182_v59 = vpop.permute.xlu1 %181  ;;  %v355_v3 = vpack.c.bf16 %v524_v52, %v522_v48  ;;  %v364_v52 = vld [vmem:[#allocation2 + $0x30] sm:$0xff] }
  0x9a   :  { %v177_v60 = vpop.permute.xlu0 %176  ;;  %v528_v62 = vpop.eup %527  ;;  %533 = vpow2.f32 %v290_v23  ;;  %v285_v63 = vsub.f32 0.0, %v277_v53  ;;  %v284_v0 = vsub.f32 0.0, %v276_v54  ;;  %v213_v1 = vsub.f32 %v182_v59, %v208_v29  ;;  %v358_v23 = vld [vmem:[#allocation2] sm:$0xff] }
  0x9b   :  { %535 = vpow2.f32 %v288_v57  ;;  %v212_v15 = vsub.f32 %v177_v60, %v208_v29  ;;  %v354_v2 = vpack.c.bf16 %v526_v55, %v528_v62  ;;  %v362_v53 = vld [vmem:[#allocation2 + $0x20] sm:$0xff]  ;;  %v365_v57 = vld [vmem:[#allocation2 + $0x38] sm:$0xff] }
  0x9c   :  { %v298_v6 = vmul.f32 1.442695, %v285_v63  ;;  %v296_v7 = vmul.f32 1.442695, %v284_v0  ;;  %v275_v8 = vmul.f32 %v213_v1, %v213_v1  ;;  %537 = vpow2.f32 %v334_v56  ;;  %v530_v20 = vpop.eup %529  ;;  %v361_v56 = vld [vmem:[#allocation2 + $0x18] sm:$0xff]  ;;  %v359_v0 = vld [vmem:[#allocation2 + $0x8] sm:$0xff] }
  0x9d   :  { %v274_v9 = vmul.f32 %v212_v15, %v212_v15  ;;  %476 = vmatprep.subr.bf16.mxu0 %v354_v2  ;;  %492 = vmatprep.subr.bf16.mxu1 %v354_v2  ;;  %v202_v51 = vpop.permute.xlu1 %201  ;;  %v532_v24 = vpop.eup %531  ;;  %v363_v1 = vld [vmem:[#allocation2 + $0x28] sm:$0xff] }
  0x9e   :  { %v197_v11 = vpop.permute.xlu0 %196  ;;  %539 = vpow2.f32 %v298_v6  ;;  %v283_v13 = vsub.f32 0.0, %v275_v8  ;;  %477 = vmatpush3.bf16.xpose.msra.mxu0 %v354_v2  ;;  %496 = vmatpush3.bf16.xpose.msra.mxu1 %v354_v2  ;;  %v217_v14 = vsub.f32 %v202_v51, %v208_v29  ;;  %v356_v30 = vpack.c.bf16 %v530_v20, %v532_v24 }
  0x9f   :  { %v216_v16 = vsub.f32 %v197_v11, %v208_v29  ;;  %541 = vpow2.f32 %v296_v7  ;;  %v282_v17 = vsub.f32 0.0, %v274_v9  ;;  %478 = vmatprep.subr.bf16.mxu0 %v355_v3  ;;  %493 = vmatprep.subr.bf16.mxu1 %v355_v3 }
  0xa0   :  { %543 = vpow2.f32 %v332_v4  ;;  %v294_v18 = vmul.f32 1.442695, %v283_v13  ;;  %v279_v10 = vmul.f32 %v217_v14, %v217_v14 }
  0xa1   :  { %v278_v19 = vmul.f32 %v216_v16, %v216_v16  ;;  %v292_v21 = vmul.f32 1.442695, %v282_v17 }
  0xa2   :  { %545 = vpow2.f32 %v294_v18  ;;  %v287_v58 = vsub.f32 0.0, %v279_v10 }
  0xa3   :  { %v286_v25 = vsub.f32 0.0, %v278_v19  ;;  %547 = vpow2.f32 %v292_v21 }
  0xa4   :  { %v534_v26 = vpop.eup %533  ;;  %v302_v27 = vmul.f32 1.442695, %v287_v58 }
  0xa5   :  { %v300_v28 = vmul.f32 1.442695, %v286_v25  ;;  %v536_v29 = vpop.eup %535  ;;  %v343_v31 = vmul.f32 %v534_v26, %v340_v22 }
  0xa6   :  { %549 = vpow2.f32 %v302_v27  ;;  %479 = vmatpush3.bf16.xpose.msra.mxu0 %v355_v3  ;;  %497 = vmatpush3.bf16.xpose.msra.mxu1 %v355_v3  ;;  %v342_v32 = vmul.f32 %v536_v29, %v340_v22  ;;  %v538_v33 = vpop.eup %537 }
  0xa7   :  { %551 = vpow2.f32 %v300_v28  ;;  %480 = vmatprep.subr.bf16.mxu0 %v356_v30  ;;  %494 = vmatprep.subr.bf16.mxu1 %v356_v30 }
  0xa8   :  { %v540_v61 = vpop.eup %539  ;;  %v350_v34 = vpack.c.bf16 %v343_v31, %v342_v32 }
  0xa9   :  { %v542_v35 = vpop.eup %541  ;;  %v347_v36 = vmul.f32 %v540_v61, %v340_v22 }
  0xaa   :  { %v544_v37 = vpop.eup %543  ;;  %484 = vmatprep.mubr.bf16.mxu0 %v350_v34  ;;  %v346_v38 = vmul.f32 %v542_v35, %v340_v22 }
  0xab   :  { %v357_v42 = vpack.c.bf16 %v538_v33, %v544_v37 }
  0xac   :  { %v546_v39 = vpop.eup %545  ;;  %v352_v40 = vpack.c.bf16 %v347_v36, %v346_v38 }
  0xad   :  { %v548_v41 = vpop.eup %547  ;;  %v345_v43 = vmul.f32 %v546_v39, %v340_v22 }
  0xae   :  { %481 = vmatpush3.bf16.xpose.msra.mxu0 %v356_v30  ;;  %498 = vmatpush3.bf16.xpose.msra.mxu1 %v356_v30  ;;  %v344_v44 = vmul.f32 %v548_v41, %v340_v22 }
  0xaf   :  { %482 = vmatprep.subr.bf16.mxu0 %v357_v42  ;;  %495 = vmatprep.subr.bf16.mxu1 %v357_v42 }
  0xb0   :  { %v550_v45 = vpop.eup %549  ;;  %488 = vmatprep.mubr.bf16.mxu1 %v352_v40  ;;  %v351_v46 = vpack.c.bf16 %v345_v43, %v344_v44 }
  0xb1   :  { %v552_v5 = vpop.eup %551  ;;  %v349_v47 = vmul.f32 %v550_v45, %v340_v22 }
  0xb2   :  { %v348_v48 = vmul.f32 %v552_v5, %v340_v22 }
  0xb4   :  { %v353_v49 = vpack.c.bf16 %v349_v47, %v348_v48 }
  0xb6   :  { %483 = vmatpush3.bf16.xpose.msra.mxu0 %v357_v42  ;;  %499 = vmatpush3.bf16.xpose.msra.mxu1 %v357_v42 }
  0xbd   :  { %485 = vmatmul.mubr.bf16.vlgmr.msra.gmra.mrb[0].mxu0 %v351_v46  ;;  %489 = vmatmul.mubr.bf16.vlgmr.msra.gmra.mrb[0].mxu1 %v353_v49 }
 0x190   :  { %v486_v54 = vpop.f32.mrb[0].mxu0  ;;  %v490_v55 = vpop.f32.mrb[0].mxu1 }
 0x191   :  { %v433_v59 = vadd.f32 %v486_v54, %v360_v50  ;;  %v437_v60 = vadd.f32 %v490_v55, %v364_v52  ;;  %v400_v62 = vpop.f32.mrb[1].mxu0  ;;  %v416_v63 = vpop.f32.mrb[1].mxu1 }
 0x192   :  { %v431_v15 = vadd.f32 %v400_v62, %v358_v23  ;;  %v435_v2 = vadd.f32 %v416_v63, %v362_v53  ;;  %v487_v3 = vpop.f32.mrb[2].mxu0  ;;  %v491_v4 = vpop.f32.mrb[2].mxu1 }
 0x193   :  { %442 = vst.msk [vmem:[#allocation2 + $0x10] sm:$0xff] %vm23_vm7, %v433_v59  ;;  %446 = vst.msk [vmem:[#allocation2 + $0x30] sm:$0xff] %vm23_vm7, %v437_v60  ;;  %v434_v6 = vadd.f32 %v487_v3, %v361_v56  ;;  %v438_v7 = vadd.f32 %v491_v4, %v365_v57  ;;  %v403_v8 = vpop.f32.mrb[3].mxu0  ;;  %v419_v9 = vpop.f32.mrb[3].mxu1 }
 0x194   :  { %440 = vst.msk [vmem:[#allocation2] sm:$0xff] %vm23_vm7, %v431_v15  ;;  %444 = vst.msk [vmem:[#allocation2 + $0x20] sm:$0xff] %vm23_vm7, %v435_v2  ;;  %v432_v51 = vadd.f32 %v403_v8, %v359_v0  ;;  %v436_v11 = vadd.f32 %v419_v9, %v363_v1 }
 0x195   :  { %443 = vst.msk [vmem:[#allocation2 + $0x18] sm:$0xff] %vm23_vm7, %v434_v6  ;;  %447 = vst.msk [vmem:[#allocation2 + $0x38] sm:$0xff] %vm23_vm7, %v438_v7 }
 0x196   :  { %441 = vst.msk [vmem:[#allocation2 + $0x8] sm:$0xff] %vm23_vm7, %v432_v51  ;;  %445 = vst.msk [vmem:[#allocation2 + $0x28] sm:$0xff] %vm23_vm7, %v436_v11 }
 0x197   :  { %564 = shalt.err (!%p561_p4)
}
 0x198   :  { %s565_s26 = scalar_lea.hbm %s743_s4, 1024 }
 0x199   :  { %p566_p5 = scmp.ne.s32.totalorder %s743_s4, %s565_s26  ;;  %p569_p6 = scmp.lt.u32.totalorder %s565_s26, %s743_s4 }
 0x19b   :  { %p571_p7 = pnand %p569_p6, %p566_p5 }
 0x19d   :  { %574 = shalt.err (!%p571_p7)
}
 0x19e   :  { %s586_s2 = smov 128   ;;  %s587_s3 = smov 8  }
 0x19f   :  { %459 = dma.vmem_to_hbm [thread:$0]  %s454_s22, 1024, %s743_s4, [#allocation3], %s586_s2, %s586_s2, %s587_s3  }
 0x1a0   :  { %575 = dma.done.wait [#allocation3], 1024  }
 0x1a1   :  { %576 = vsyncadd [#allocation3], 4294966272 }
 0x1a2   :  { %463 = vsyncpa [#allocation3], 1 }

</bundles_post_ra>
